<compile_context>
chip_gen: v6e
topology: v6e:2x2x1
jax: 0.10.0
libtpu: 0.0.40
codegen_flags: <defaults>
</compile_context>

<pallas_src>
import functools

import jax
import jax.numpy as jnp
from jax import lax
from jax.experimental import pallas as pl
from jax.experimental.pallas import tpu as pltpu

LANE = 128


def _round_up(x, m):
    return ((x + m - 1) // m) * m


def _cdiv(a, b):
    return -(-a // b)


def _smooth_pinball_kernel(q_ref, pred_ref, tgt_ref, out_ref, *,
                           alpha, beta, n_valid, tile_n, mask_last_block):
    pred = pred_ref[...].astype(jnp.float32)          # (Q, tile_n), lane-dense
    tgt = tgt_ref[...].astype(jnp.float32)
    q = q_ref[...]                                    # (Q, 1) f32, lane-broadcast

    error = tgt - pred
    q_error = q * error

    # PyTorch F.softplus(x, beta, threshold=20):
    #   x                        if beta*x > 20
    #   log1p(exp(beta*x))/beta  otherwise
    # Multiply by alpha (== 1/beta; ~1 ulp from the reference's /beta) and clamp
    # the exp argument so the discarded select branch never overflows — this
    # also keeps the uninitialized overhang columns of the last block harmless.
    x = -error
    bx = beta * x
    soft = jnp.where(bx > 20.0, x,
                     jnp.log1p(jnp.exp(jnp.minimum(bx, 20.0))) * alpha)

    losses = q_error + soft                           # (Q, tile_n)

    if mask_last_block:
        i = pl.program_id(0)
        is_last = i == pl.num_programs(0) - 1

        @pl.when(jnp.logical_not(is_last))
        def _():
            # Interior blocks: every column is valid, no mask cost.
            out_ref[...] = jnp.sum(losses, axis=0, keepdims=True)

        @pl.when(is_last)
        def _():
            # Only the block straddling the batch boundary pays for the iota +
            # mask.  Keep this a select (NOT multiply-by-mask): the overhanging
            # columns contain uninitialized data that may be NaN/Inf.
            col = i * tile_n + lax.broadcasted_iota(jnp.int32, losses.shape, 1)
            masked = jnp.where(col < n_valid, losses, 0.0)
            out_ref[...] = jnp.sum(masked, axis=0, keepdims=True)
    else:
        # Batch is an exact multiple of tile_n: no padding columns anywhere.
        out_ref[...] = jnp.sum(losses, axis=0, keepdims=True)


def smooth_pinball_loss(pred, target, quantiles, alpha=0.001, *, max_tile_n=32768):
    """pred, target: (B, Q) float (f32 or bf16); quantiles: (Q,). Returns scalar f32."""
    B, Q = pred.shape
    assert target.shape == (B, Q)
    quantiles = jnp.asarray(quantiles).reshape(-1)
    assert quantiles.shape == (Q,)
    beta = 1.0 / alpha

    # Lane-dense layout: batch on the 128-lane axis, quantiles on sublanes.
    # NOTE: this transpose is one extra HBM pass per input; if the producer can
    # hand the loss feature-major (Q, B) data, feed that in directly instead.
    pred_t = pred.T                                   # (Q, B), original dtype
    tgt_t = target.T

    # Tile policy: big lane tiles (~2 MB of input per grid step) to amortize the
    # ~0.35 us/step pipeline overhead; once the batch is large enough (>= 16K
    # lanes) force >= 2 blocks so v7x's two TensorCores both get work (the grid
    # axis is "parallel").  On v7x with very large B, max_tile_n=65536 is a
    # further win (still under the per-TC VMEM ceiling with the limit below).
    b_min = _round_up(max(B, LANE), LANE)
    min_blocks = 2 if b_min >= 16384 else 1
    n_blocks = max(min_blocks, _cdiv(b_min, max_tile_n))
    tile_n = _round_up(_cdiv(b_min, n_blocks), LANE)
    n_blocks = max(min_blocks, _cdiv(b_min, tile_n))
    b_out = n_blocks * tile_n     # output is a fresh allocation; rounding is free

    # No jnp.pad of the inputs: the last input block may overhang the (Q, B)
    # arrays (Pallas pads that DMA); the kernel masks the overhang columns.
    mask_last_block = (B % tile_n) != 0

    q_col = quantiles.astype(jnp.float32).reshape(Q, 1)

    kernel = functools.partial(
        _smooth_pinball_kernel, alpha=alpha, beta=beta,
        n_valid=B, tile_n=tile_n, mask_last_block=mask_last_block)

    # VMEM budget with sublane padding: a (Q, tile_n) input block pads Q up to
    # the dtype's sublane tile (8 for f32, 16 for bf16), double-buffered, x2
    # inputs; the (1, tile_n) f32 output pads to 8 sublanes, double-buffered;
    # plus headroom for the f32 compute temporaries.  Only override the default
    # 32 MiB scoped limit when needed, capped at v7x's 64 MiB per-TC physical.
    itemsize = jnp.dtype(pred.dtype).itemsize
    sublane_tile = 8 * max(1, 4 // itemsize)
    in_bytes = 2 * 2 * _round_up(Q, sublane_tile) * tile_n * itemsize
    out_bytes = 2 * 8 * tile_n * 4
    tmp_bytes = 4 * _round_up(Q, 8) * tile_n * 4
    vmem_est = int(1.25 * (in_bytes + out_bytes + tmp_bytes))
    vmem_limit = min(vmem_est, 64 << 20) if vmem_est > (32 << 20) else None

    partials = pl.pallas_call(
        kernel,
        out_shape=jax.ShapeDtypeStruct((1, b_out), jnp.float32),
        grid_spec=pltpu.PrefetchScalarGridSpec(
            num_scalar_prefetch=0,
            grid=(n_blocks,),
            in_specs=[
                pl.BlockSpec((Q, 1), lambda i: (0, 0)),        # quantiles (resident)
                pl.BlockSpec((Q, tile_n), lambda i: (0, i)),   # pred^T
                pl.BlockSpec((Q, tile_n), lambda i: (0, i)),   # target^T
            ],
            out_specs=pl.BlockSpec((1, tile_n), lambda i: (0, i)),
        ),
        compiler_params=pltpu.CompilerParams(
            # Independent per-block partials -> v7x megacore can shard blocks.
            dimension_semantics=("parallel",),
            vmem_limit_bytes=vmem_limit,
        ),
    )(q_col, pred_t, tgt_t)

    # Overhang columns were written as zeros in-kernel, so summing everything is
    # unbiased; single cross-lane reduce + mean over the batch in the wrapper.
    return jnp.sum(partials) / jnp.float32(B)


def _reference(pred, target, quantiles, alpha=0.001):
    beta = 1.0 / alpha
    error = target - pred
    q_error = quantiles[None, :] * error
    x = -error
    bx = beta * x
    soft_error = jnp.where(bx > 20.0, x, jnp.log1p(jnp.exp(bx)) / beta)
    losses = q_error + soft_error
    return jnp.mean(jnp.sum(losses, axis=1))


if __name__ == "__main__":
    key = jax.random.PRNGKey(0)
    B, Q = 16, 9                      # batch=16, 9 quantiles
    k1, k2 = jax.random.split(key)
    pred = jax.random.normal(k1, (B, Q), dtype=jnp.float32)
    target = jax.random.normal(k2, (B, Q), dtype=jnp.float32)
    quantiles = jnp.linspace(0.1, 0.9, Q, dtype=jnp.float32)

    loss = smooth_pinball_loss(pred, target, quantiles, alpha=0.001)
    loss = jax.block_until_ready(loss)

    ref = _reference(pred, target, quantiles, alpha=0.001)
    assert jnp.allclose(loss, ref, rtol=1e-5, atol=1e-5), (loss, ref)
    print("KERNEL_OK")
</pallas_src>

<mosaic_0001>
module attributes {stable_mosaic.version = 11 : i64} {
  func.func @_smooth_pinball_kernel(%arg0: i32, %arg1: memref<9x1xf32, #tpu.memory_space<vmem>>, %arg2: memref<9x128xf32, #tpu.memory_space<vmem>>, %arg3: memref<9x128xf32, #tpu.memory_space<vmem>>, %arg4: memref<1x128xf32, #tpu.memory_space<vmem>>) attributes {dimension_semantics = [#tpu.dimension_semantics<parallel>], iteration_bounds = array<i64: 1>, scalar_prefetch = 0 : i64, scratch_operands = 0 : i64, tpu.core_type = #tpu.core_type<tc>, window_params = [{pipeline_mode = #tpu.pipeline_mode<synchronous>, transform_indices = @transform_0, window_bounds = array<i64: 9, 1>}, {transform_indices = @transform_1, window_bounds = array<i64: 9, 128>}, {transform_indices = @transform_2, window_bounds = array<i64: 9, 128>}, {transform_indices = @transform_3, window_bounds = array<i64: 1, 128>}]} {
    %c0 = arith.constant 0 : index
    %c0_0 = arith.constant 0 : index
    %0 = vector.load %arg2[%c0, %c0_0] : memref<9x128xf32, #tpu.memory_space<vmem>>, vector<9x128xf32>
    %c0_1 = arith.constant 0 : index
    %c0_2 = arith.constant 0 : index
    %1 = vector.load %arg3[%c0_1, %c0_2] : memref<9x128xf32, #tpu.memory_space<vmem>>, vector<9x128xf32>
    %c0_3 = arith.constant 0 : index
    %c0_4 = arith.constant 0 : index
    %2 = vector.load %arg1[%c0_3, %c0_4] : memref<9x1xf32, #tpu.memory_space<vmem>>, vector<9x1xf32>
    %3 = arith.subf %1, %0 : vector<9x128xf32>
    %4 = vector.broadcast %2 : vector<9x1xf32> to vector<9x128xf32>
    %5 = arith.mulf %4, %3 : vector<9x128xf32>
    %cst = arith.constant 0.000000e+00 : f32
    %6 = vector.broadcast %cst : f32 to vector<9x128xf32>
    %7 = arith.subf %6, %3 : vector<9x128xf32>
    %cst_5 = arith.constant 1.000000e+03 : f32
    %8 = vector.broadcast %cst_5 : f32 to vector<9x128xf32>
    %9 = arith.mulf %8, %7 : vector<9x128xf32>
    %cst_6 = arith.constant 2.000000e+01 : f32
    %10 = vector.broadcast %cst_6 : f32 to vector<9x128xf32>
    %11 = arith.cmpf ogt, %9, %10 : vector<9x128xf32>
    %cst_7 = arith.constant 2.000000e+01 : f32
    %12 = vector.broadcast %cst_7 : f32 to vector<9x128xf32>
    %13 = arith.minimumf %9, %12 : vector<9x128xf32>
    %14 = math.exp %13 : vector<9x128xf32>
    %15 = math.log1p %14 : vector<9x128xf32>
    %cst_8 = arith.constant 1.000000e-03 : f32
    %16 = vector.broadcast %cst_8 : f32 to vector<9x128xf32>
    %17 = arith.mulf %15, %16 : vector<9x128xf32>
    %18 = arith.select %11, %7, %17 : vector<9x128xi1>, vector<9x128xf32>
    %19 = arith.addf %5, %18 : vector<9x128xf32>
    %c0_i32 = arith.constant 0 : i32
    %20 = arith.cmpi eq, %arg0, %c0_i32 : i32
    %true = arith.constant true
    %21 = arith.xori %20, %true : i1
    %22 = arith.extui %21 : i1 to i32
    %c0_i32_9 = arith.constant 0 : i32
    %23 = arith.cmpi ne, %22, %c0_i32_9 : i32
    scf.if %23 {
      %cst_11 = arith.constant dense<0.000000e+00> : vector<128xf32>
      %26 = vector.multi_reduction <add>, %19, %cst_11 [0] : vector<9x128xf32> to vector<128xf32>
      %27 = vector.shape_cast %26 : vector<128xf32> to vector<1x128xf32>
      %c0_12 = arith.constant 0 : index
      %c0_13 = arith.constant 0 : index
      %28 = vector.load %arg4[%c0_12, %c0_13] : memref<1x128xf32, #tpu.memory_space<vmem>>, vector<1x128xf32>
      tpu.vector_store %arg4[%c0_12, %c0_13], %27 {strides = array<i32>} : memref<1x128xf32, #tpu.memory_space<vmem>>, vector<1x128xf32>,
    } else {
    }
    %24 = arith.extui %20 : i1 to i32
    %c0_i32_10 = arith.constant 0 : i32
    %25 = arith.cmpi ne, %24, %c0_i32_10 : i32
    scf.if %25 {
      %c128_i32 = arith.constant 128 : i32
      %26 = arith.muli %arg0, %c128_i32 : i32
      %27 = tpu.iota {dimensions = array<i32: 1>} : vector<9x128xi32>
      %28 = vector.broadcast %26 : i32 to vector<9x128xi32>
      %29 = arith.addi %28, %27 : vector<9x128xi32>
      %c16_i32 = arith.constant 16 : i32
      %30 = vector.broadcast %c16_i32 : i32 to vector<9x128xi32>
      %31 = arith.cmpi slt, %29, %30 : vector<9x128xi32>
      %cst_11 = arith.constant 0.000000e+00 : f32
      %32 = vector.broadcast %cst_11 : f32 to vector<9x128xf32>
      %33 = arith.select %31, %19, %32 : vector<9x128xi1>, vector<9x128xf32>
      %cst_12 = arith.constant dense<0.000000e+00> : vector<128xf32>
      %34 = vector.multi_reduction <add>, %33, %cst_12 [0] : vector<9x128xf32> to vector<128xf32>
      %35 = vector.shape_cast %34 : vector<128xf32> to vector<1x128xf32>
      %c0_13 = arith.constant 0 : index
      %c0_14 = arith.constant 0 : index
      %36 = vector.load %arg4[%c0_13, %c0_14] : memref<1x128xf32, #tpu.memory_space<vmem>>, vector<1x128xf32>
      tpu.vector_store %arg4[%c0_13, %c0_14], %35 {strides = array<i32>} : memref<1x128xf32, #tpu.memory_space<vmem>>, vector<1x128xf32>,
    } else {
    }
    return
  }
  func.func @transform_0(%arg0: i32) -> (i32, i32) {
    %c0_i32 = arith.constant 0 : i32
    %c0_i32_0 = arith.constant 0 : i32
    %c0_i32_1 = arith.constant 0 : i32
    return %c0_i32, %c0_i32_0 : i32, i32
  }
  func.func @transform_1(%arg0: i32) -> (i32, i32) {
    %c0_i32 = arith.constant 0 : i32
    %c0_i32_0 = arith.constant 0 : i32
    return %c0_i32, %arg0 : i32, i32
  }
  func.func @transform_2(%arg0: i32) -> (i32, i32) {
    %c0_i32 = arith.constant 0 : i32
    %c0_i32_0 = arith.constant 0 : i32
    return %c0_i32, %arg0 : i32, i32
  }
  func.func @transform_3(%arg0: i32) -> (i32, i32) {
    %c0_i32 = arith.constant 0 : i32
    %c0_i32_0 = arith.constant 0 : i32
    return %c0_i32, %arg0 : i32, i32
  }
}

</mosaic_0001>

<bundles_post_ra>
// kernel: tpu_custom_call.1
= control target key start
LH: loop header
LB: loop body
LE: loop exit
PB: predicated region body
PF: predicated region fallthrough
CT: control target
= control target key end

     0   :  { %8 = vsyncpa [#allocation3], 0  ;;  %s237_s0 = inlined_call_operand.vmem [shape: f32[9,1], index: 0, kind: input, shape index: {}]   ;;  %s238_s1 = inlined_call_operand.vmem [shape: f32[9,16], index: 1, kind: input, shape index: {}]   ;;  %s239_s2 = inlined_call_operand.hbm [shape: f32[9,16], index: 2, kind: input, shape index: {}]   ;;  %s240_s3 = inlined_call_operand.hbm [shape: f32[1,128], index: 3, kind: output, shape index: {}]  }
   0x1   :  { %9 = vsyncpa [#allocation4], 0  ;;  %s194_s12 = smov [#allocation2]  }
   0x2   :  { %s19_s13 = sshll.u32 %s194_s12, 4  ;;  %s20_s13 = int_to_ptr.vmem [resolvable:$true] %s19_s13 }
   0x3   :  { %s158_s14 = scalar_lea.vmem %s20_s13, 256  ;;  %p163_p1 = scmp.lt.s32.totalorder %s20_s13, %s20_s13 }
   0x4   :  { %p159_p0 = scmp.ne.s32.totalorder %s20_s13, %s158_s14  ;;  %p164_p2 = scmp.lt.s32.totalorder %s158_s14, %s158_s14 }
   0x6   :  { %p165_p3 = por %p164_p2, %p163_p1 }
   0x8   :  { %p166_p4 = pnand %p165_p3, %p159_p0 }
   0xa   :  { %169 = shalt.err (!%p166_p4)
}
   0xb   :  { %s195_s15 = smov 128   ;;  %s196_s16 = smov 8  }
   0xc   :  { %25 = dma.hbm_to_vmem [thread:$0]  %s239_s2, 256, %s20_s13, [#allocation3], %s195_s15, %s195_s15, %s196_s16  }
   0xd   :  { %190 = dma.done.wait [#allocation3], 256  }
   0xe   :  { %191 = vsyncadd [#allocation3], 4294967040  ;;  %v197_v0 = vmov 0   ;;  %v34_v1 = vld [vmem:[%s237_s0 + $0x8] sm:$0x1]  ;;  %v33_v2 = vld [vmem:[%s237_s0] sm:$0xff]  ;;  %v104_v34 = vlaneseq }
   0xf   :  { %141 = vset.pattern.permute.xlu0 %v197_v0  ;;  %v30_v3 = vld [vmem:[%s238_s1 + $0x8] sm:$0x1]  ;;  %v29_v6 = vld [vmem:[%s238_s1] sm:$0xff]  ;;  %vm111_vm5 = vcmask 1040384   ;;  %s198_s0 = smov [#allocation5]  }
  0x10   :  { %44 = vperm.xlu0 %141, %v34_v1   ;;  %v32_v4 = vld [vmem:[#allocation2 + $0x8] sm:$0x1]  ;;  %v31_v7 = vld [vmem:[#allocation2] sm:$0xff]  ;;  %v105_v37 = vand.u32 127, %v104_v34  ;;  %s127_s1 = sshll.u32 %s198_s0, 4  ;;  %s128_s1 = int_to_ptr.vmem [resolvable:$true] %s127_s1 }
  0x11   :  { %v36_v5 = vsub.f32 %v32_v4, %v30_v3  ;;  %v35_v9 = vsub.f32 %v31_v7, %v29_v6  ;;  %s170_s26 = scalar_lea.vmem %s128_s1, 16  ;;  %s174_s27 = scalar_lea.vmem %s128_s1, 32 }
  0x12   :  { %vm108_vm4 = vcmp.lt.s32.totalorder %v105_v37, 16  ;;  %p171_p5 = scmp.ne.s32.totalorder %s128_s1, %s170_s26  ;;  %p175_p6 = scmp.lt.s32.totalorder %s128_s1, %s128_s1 }
  0x13   :  { %v50_v8 = vsub.f32 0.0, %v36_v5  ;;  %v49_v11 = vsub.f32 0.0, %v35_v9  ;;  %p176_p7 = scmp.lt.s32.totalorder %s174_s27, %s170_s26 }
  0x14   :  { %39 = vperm.xlu0 %141, %v33_v2  }
  0x15   :  { %v52_v10 = vmul.f32 1000.0, %v50_v8  ;;  %v51_v13 = vmul.f32 1000.0, %v49_v11  ;;  %p177_p8 = por %p176_p7, %p175_p6 }
  0x17   :  { %v56_v12 = vmin.f32 %v52_v10, 20.0  ;;  %v55_v15 = vmin.f32 %v51_v13, 20.0  ;;  %vm54_vm2 = vcmp.gt.f32.partialorder %v52_v10, 20.0  ;;  %vm53_vm3 = vcmp.gt.f32.partialorder %v51_v13, 20.0  ;;  %p178_p9 = pnand %p177_p8, %p171_p5 }
  0x19   :  { %v59_v14 = vmul.f32 1.442695, %v56_v12  ;;  %v57_v16 = vmul.f32 1.442695, %v55_v15 }
  0x1b   :  { %142 = vpow2.f32 %v59_v14 }
  0x1c   :  { %144 = vpow2.f32 %v57_v16 }
  0x28   :  { %v143_v17 = vpop.eup %142 }
  0x29   :  { %v70_v18 = vadd.f32 1.0, %v143_v17  ;;  %v145_v19 = vpop.eup %144  ;;  %v73_v21 = vmul.f32 -0.5, %v143_v17  ;;  %v76_v25 = vand.u32 2147483647, %v143_v17 }
  0x2a   :  { %v61_v20 = vadd.f32 1.0, %v145_v19  ;;  %v64_v23 = vmul.f32 -0.5, %v145_v19  ;;  %v67_v30 = vand.u32 2147483647, %v145_v19 }
  0x2b   :  { %146 = vlog2.f32 %v70_v18  ;;  %v74_v22 = vadd.f32 1.0, %v73_v21  ;;  %vm77_vm0 = vcmp.lt.f32.partialorder %v76_v25, 0.0004427343 }
  0x2c   :  { %148 = vlog2.f32 %v61_v20  ;;  %v65_v28 = vadd.f32 1.0, %v64_v23  ;;  %vm68_vm1 = vcmp.lt.f32.partialorder %v67_v30, 0.0004427343 }
  0x2d   :  { %v75_v27 = vmul.f32 %v143_v17, %v74_v22 }
  0x2e   :  { %v66_v33 = vmul.f32 %v145_v19, %v65_v28 }
  0x38   :  { %v147_v24 = vpop.eup %146 }
  0x39   :  { %v72_v26 = vmul.f32 0.6931472, %v147_v24  ;;  %v149_v29 = vpop.eup %148 }
  0x3a   :  { %v63_v32 = vmul.f32 0.6931472, %v149_v29 }
  0x3b   :  { %v78_v31 = vsel %vm77_vm0, %v75_v27, %v72_v26 }
  0x3c   :  { %v80_v35 = vmul.f32 0.001, %v78_v31  ;;  %v69_v36 = vsel %vm68_vm1, %v66_v33, %v63_v32 }
  0x3d   :  { %v79_v40 = vmul.f32 0.001, %v69_v36 }
  0x3e   :  { %v82_v39 = vsel %vm54_vm2, %v50_v8, %v80_v35 }
  0x3f   :  { %v81_v44 = vsel %vm53_vm3, %v49_v11, %v79_v40 }
  0x8b   :  { %v45_v38 = vpop.permute.xlu0 %44 }
  0x8c   :  { %v48_v41 = vmul.f32 %v45_v38, %v36_v5 }
  0x8e   :  { %v84_v42 = vadd.f32 %v82_v39, %v48_v41 }
  0x8f   :  { %v40_v43 = vpop.permute.xlu0 %39 }
  0x90   :  { %v47_v45 = vmul.f32 %v40_v43, %v35_v9  ;;  %v110_v46 = vsel %vm108_vm4, %v84_v42, 0.0 }
  0x91   :  { %v112_v48 = vsel %vm111_vm5, %v110_v46, 0.0 }
  0x92   :  { %v83_v47 = vadd.f32 %v81_v44, %v47_v45 }
  0x94   :  { %v109_v49 = vsel %vm108_vm4, %v83_v47, 0.0 }
  0x95   :  { %v113_v50 = vadd.f32 %v112_v48, %v109_v49 }
  0x97   :  { %v114_v51 = vrot.slane %v113_v50, 4 }
  0x99   :  { %v115_v52 = vadd.f32 %v114_v51, %v113_v50 }
  0x9b   :  { %v116_v53 = vrot.slane %v115_v52, 2 }
  0x9d   :  { %v117_v54 = vadd.f32 %v116_v53, %v115_v52 }
  0x9f   :  { %v118_v55 = vrot.slane %v117_v54, 1 }
  0xa1   :  { %v119_v56 = vadd.f32 %v118_v55, %v117_v54 }
  0xa3   :  { %120 = vst [vmem:[#allocation5] sm:$0x1] %v119_v56 }
  0xa4   :  { %181 = shalt.err (!%p178_p9)
}
  0xa5   :  { %130 = dma.vmem_to_hbm [thread:$0]  %s128_s1, 16, %s240_s3, [#allocation4]  }
  0xa6   :  { %192 = dma.done.wait [#allocation4], 16  }
  0xa7   :  { %193 = vsyncadd [#allocation4], 4294967280 }
  0xa8   :  { %134 = vsyncpa [#allocation3], 1 }
  0xa9   :  { %135 = vsyncpa [#allocation4], 1 }

</bundles_post_ra>
